<compile_context>
chip_gen: v5e
topology: v5e:2x2
jax: 0.10.0
libtpu: 0.0.40
codegen_flags: <defaults>
</compile_context>

<pallas_src>
import jax
import jax.numpy as jnp
from jax.experimental import pallas as pl
from jax.experimental.pallas import tpu as pltpu


def _round_up(v, m):
    return (v + m - 1) // m * m


# ---------------------------------------------------------------------------
# Kernel: fc1 -> ReLU -> fc2 -> Sigmoid, fused over one batch tile.
# ---------------------------------------------------------------------------
def decoder_kernel(x_ref, w1_ref, b1_ref, w2_ref, b2_ref, o_ref):
    # x arrives in its original dtype; cast to the weights' dtype (bf16) for the
    # MXU and accumulate in f32.
    x = x_ref[...].astype(w1_ref.dtype)                             # [tile, K]

    # fc1 + ReLU (MXU matmul, f32 accumulate; bias add / ReLU in f32 on the VPU)
    h = jnp.dot(x, w1_ref[...], preferred_element_type=jnp.float32) + b1_ref[...]
    h = jnp.maximum(h, 0.0)

    # fc2 + Sigmoid.  sigmoid(y) == 0.5*(tanh(y/2)+1): exact identity, and the
    # tanh goes to the EUP slot instead of a VALU divide chain.
    h = h.astype(w2_ref.dtype)
    y = jnp.dot(h, w2_ref[...], preferred_element_type=jnp.float32) + b2_ref[...]
    o_ref[...] = (0.5 * (jnp.tanh(0.5 * y) + 1.0)).astype(o_ref.dtype)


# ---------------------------------------------------------------------------
# One-time parameter preparation (hoisted out of the per-call path).
# ---------------------------------------------------------------------------
def prepare_params(params, *, compute_dtype=jnp.bfloat16):
    """Pad hidden/output feature dims to multiples of 128 (lane-dense) and cast
    weights to the MXU compute dtype.  Call ONCE; reuse the result per forward.

    params: w1 [K, H], b1 [1, H], w2 [H, N], b2 [1, N]
    (weights already transposed from PyTorch's [out, in] layout)."""
    w1, b1, w2, b2 = params["w1"], params["b1"], params["w2"], params["b2"]
    K, H = w1.shape
    N = w2.shape[1]
    assert w2.shape[0] == H and b1.shape == (1, H) and b2.shape == (1, N)

    Hp = _round_up(H, 128)
    Np = _round_up(N, 128)

    # Zero padding is exact: padded h columns are relu(0 + 0) = 0 and multiply
    # zero rows of w2p; padded output columns (if any) are sliced off.
    w1p = jnp.zeros((K, Hp), compute_dtype).at[:, :H].set(w1.astype(compute_dtype))
    b1p = jnp.zeros((1, Hp), jnp.float32).at[:, :H].set(b1.astype(jnp.float32))
    w2p = jnp.zeros((Hp, Np), compute_dtype).at[:H, :N].set(w2.astype(compute_dtype))
    b2p = jnp.zeros((1, Np), jnp.float32).at[:, :N].set(b2.astype(jnp.float32))

    return dict(w1=w1p, b1=b1p, w2=w2p, b2=b2p, in_features=K, out_features=N)


# ---------------------------------------------------------------------------
# Batch-tile selection.
# ---------------------------------------------------------------------------
def _pick_batch_tile(batch, requested):
    if requested is not None:
        tile = requested
    elif batch >= 4096:
        tile = 512            # amortize per-grid-step overhead on big batches
    elif batch >= 1024:
        tile = 256
    else:
        tile = 128
    tile = min(tile, 512)     # v7x: keep double-buffered f32 out tile << 64 MiB VMEM
    if tile >= batch:
        # Small batch: split into two roughly equal tiles (multiple of 16) so the
        # 'parallel' grid has >= 2 steps and both v7x TensorCores get work.
        # Otherwise fall back to one full-batch block (block dim == full array
        # dim is always legal).
        half = _round_up(pl.cdiv(batch, 2), 16)
        tile = half if half < batch else batch
    return tile


# ---------------------------------------------------------------------------
# Forward wrapper.
# ---------------------------------------------------------------------------
def decoder_forward(x, prepared, *, batch_tile=None, out_dtype=jnp.float32,
                    vmem_limit_bytes=32 * 1024 * 1024):
    """x: [B, K].  prepared: result of prepare_params().
    Set out_dtype=jnp.bfloat16 if the consumer accepts bf16 (halves writeback)."""
    B, K = x.shape
    assert K == prepared["in_features"], "latent size mismatch"
    w1p, b1p, w2p, b2p = prepared["w1"], prepared["b1"], prepared["w2"], prepared["b2"]
    N = prepared["out_features"]
    Np = w2p.shape[1]

    tile = _pick_batch_tile(B, batch_tile)
    grid = (pl.cdiv(B, tile),)   # ragged last block is masked by Pallas

    def invariant(shape):
        # Grid-invariant block: fetched once, stays resident in VMEM.
        # TODO(synk): on VMEM-tight v7x configs add pipeline_mode=pl.Buffered(1)
        # here to drop the unneeded double buffer for these invariant blocks.
        return pl.BlockSpec(shape, lambda i: (0, 0))

    out = pl.pallas_call(
        decoder_kernel,
        out_shape=jax.ShapeDtypeStruct((B, Np), out_dtype),
        grid_spec=pltpu.PrefetchScalarGridSpec(
            num_scalar_prefetch=0,
            grid=grid,
            in_specs=[
                pl.BlockSpec((tile, K), lambda i: (i, 0)),      # x batch tile
                invariant(w1p.shape), invariant(b1p.shape),
                invariant(w2p.shape), invariant(b2p.shape),
            ],
            out_specs=pl.BlockSpec((tile, Np), lambda i: (i, 0)),
        ),
        compiler_params=pltpu.CompilerParams(
            dimension_semantics=("parallel",),       # batch axis shards across TCs
            vmem_limit_bytes=vmem_limit_bytes,
        ),
    )(x, w1p, b1p, w2p, b2p)

    # No slice when the output feature dim is already lane-aligned (e.g. 3072).
    return out if Np == N else out[:, :N]


# ---------------------------------------------------------------------------
# Init + pure-JAX reference (same bf16-input / f32-accumulate recipe).
# ---------------------------------------------------------------------------
def init_linear(key, in_features, out_features):
    """PyTorch nn.Linear-style init: U(-1/sqrt(in), 1/sqrt(in)).
    Returns weight [in, out] (already transposed) and bias [1, out]."""
    kw, kb = jax.random.split(key)
    bound = 1.0 / jnp.sqrt(jnp.float32(in_features))
    w = jax.random.uniform(kw, (in_features, out_features), jnp.float32,
                           minval=-bound, maxval=bound)
    b = jax.random.uniform(kb, (1, out_features), jnp.float32,
                           minval=-bound, maxval=bound)
    return w, b


def make_params(key, input_size, hidden_size, output_size):
    k1, k2 = jax.random.split(key)
    w1, b1 = init_linear(k1, input_size, hidden_size)    # fc1
    w2, b2 = init_linear(k2, hidden_size, output_size)   # fc2
    return dict(w1=w1, b1=b1, w2=w2, b2=b2)


def decoder_ref(x, p, compute_dtype=jnp.bfloat16):
    cd = compute_dtype
    h = jnp.dot(x.astype(cd), p["w1"].astype(cd),
                preferred_element_type=jnp.float32) + p["b1"]
    h = jnp.maximum(h, 0.0)
    y = jnp.dot(h.astype(cd), p["w2"].astype(cd),
                preferred_element_type=jnp.float32) + p["b2"]
    return jax.nn.sigmoid(y)


if __name__ == "__main__":
    # Small decoder consistent with the module: latent -> hidden -> flat image.
    # hidden=96 exercises the H->128 padding; output=256 is lane-aligned (no
    # trailing slice, like the real 3072 CIFAR output); batch=20 is not a tile
    # multiple, exercising the ragged (masked) last batch block.
    input_size, hidden_size, output_size = 64, 96, 256
    batch = 20

    key = jax.random.PRNGKey(0)
    kx, kp = jax.random.split(key)
    x = jax.random.normal(kx, (batch, input_size), jnp.float32)
    params = make_params(kp, input_size, hidden_size, output_size)

    prepared = prepare_params(params)       # one-time pad + bf16 cast
    out = jax.block_until_ready(decoder_forward(x, prepared))

    ref = decoder_ref(x, params)
    assert out.shape == (batch, output_size), out.shape
    max_err = float(jnp.max(jnp.abs(out - ref)))
    assert jnp.allclose(out, ref, atol=2e-3, rtol=2e-3), f"max abs err {max_err}"

    print("KERNEL_OK")
</pallas_src>

<mosaic_0001>
module attributes {stable_mosaic.version = 11 : i64} {
  func.func @decoder_kernel(%arg0: i32, %arg1: memref<16x64xf32, #tpu.memory_space<vmem>>, %arg2: memref<64x128xbf16, #tpu.memory_space<vmem>>, %arg3: memref<1x128xf32, #tpu.memory_space<vmem>>, %arg4: memref<128x256xbf16, #tpu.memory_space<vmem>>, %arg5: memref<1x256xf32, #tpu.memory_space<vmem>>, %arg6: memref<16x256xf32, #tpu.memory_space<vmem>>) attributes {dimension_semantics = [#tpu.dimension_semantics<parallel>], iteration_bounds = array<i64: 2>, scalar_prefetch = 0 : i64, scratch_operands = 0 : i64, tpu.core_type = #tpu.core_type<tc>, window_params = [{transform_indices = @transform_0, window_bounds = array<i64: 16, 64>}, {pipeline_mode = #tpu.pipeline_mode<synchronous>, transform_indices = @transform_1, window_bounds = array<i64: 64, 128>}, {pipeline_mode = #tpu.pipeline_mode<synchronous>, transform_indices = @transform_2, window_bounds = array<i64: 1, 128>}, {pipeline_mode = #tpu.pipeline_mode<synchronous>, transform_indices = @transform_3, window_bounds = array<i64: 128, 256>}, {pipeline_mode = #tpu.pipeline_mode<synchronous>, transform_indices = @transform_4, window_bounds = array<i64: 1, 256>}, {transform_indices = @transform_5, window_bounds = array<i64: 16, 256>}]} {
    %c0 = arith.constant 0 : index
    %c0_0 = arith.constant 0 : index
    %0 = vector.load %arg1[%c0, %c0_0] : memref<16x64xf32, #tpu.memory_space<vmem>>, vector<16x64xf32>
    %1 = arith.truncf %0 : vector<16x64xf32> to vector<16x64xbf16>
    %c0_1 = arith.constant 0 : index
    %c0_2 = arith.constant 0 : index
    %2 = vector.load %arg2[%c0_1, %c0_2] : memref<64x128xbf16, #tpu.memory_space<vmem>>, vector<64x128xbf16>
    %cst = arith.constant dense<0.000000e+00> : vector<16x128xf32>
    %3 = tpu.matmul %1, %2, %cst {dimension_numbers = #tpu.dot_dimension_numbers<[1], [0], [0], [1], [0, 0, 1, 1], [], []>} : vector<16x64xbf16>, vector<64x128xbf16>, vector<16x128xf32> -> vector<16x128xf32>
    %c0_3 = arith.constant 0 : index
    %c0_4 = arith.constant 0 : index
    %4 = vector.load %arg3[%c0_3, %c0_4] : memref<1x128xf32, #tpu.memory_space<vmem>>, vector<1x128xf32>
    %5 = vector.broadcast %4 : vector<1x128xf32> to vector<16x128xf32>
    %6 = arith.addf %3, %5 : vector<16x128xf32>
    %cst_5 = arith.constant 0.000000e+00 : f32
    %7 = vector.broadcast %cst_5 : f32 to vector<16x128xf32>
    %8 = arith.maximumf %6, %7 : vector<16x128xf32>
    %9 = arith.truncf %8 : vector<16x128xf32> to vector<16x128xbf16>
    %c0_6 = arith.constant 0 : index
    %c0_7 = arith.constant 0 : index
    %10 = vector.load %arg4[%c0_6, %c0_7] : memref<128x256xbf16, #tpu.memory_space<vmem>>, vector<128x256xbf16>
    %cst_8 = arith.constant dense<0.000000e+00> : vector<16x256xf32>
    %11 = tpu.matmul %9, %10, %cst_8 {dimension_numbers = #tpu.dot_dimension_numbers<[1], [0], [0], [1], [0, 0, 1, 1], [], []>} : vector<16x128xbf16>, vector<128x256xbf16>, vector<16x256xf32> -> vector<16x256xf32>
    %c0_9 = arith.constant 0 : index
    %c0_10 = arith.constant 0 : index
    %12 = vector.load %arg5[%c0_9, %c0_10] : memref<1x256xf32, #tpu.memory_space<vmem>>, vector<1x256xf32>
    %13 = vector.broadcast %12 : vector<1x256xf32> to vector<16x256xf32>
    %14 = arith.addf %11, %13 : vector<16x256xf32>
    %cst_11 = arith.constant 5.000000e-01 : f32
    %15 = vector.broadcast %cst_11 : f32 to vector<16x256xf32>
    %16 = arith.mulf %15, %14 : vector<16x256xf32>
    %17 = math.tanh %16 : vector<16x256xf32>
    %cst_12 = arith.constant 1.000000e+00 : f32
    %18 = vector.broadcast %cst_12 : f32 to vector<16x256xf32>
    %19 = arith.addf %17, %18 : vector<16x256xf32>
    %cst_13 = arith.constant 5.000000e-01 : f32
    %20 = vector.broadcast %cst_13 : f32 to vector<16x256xf32>
    %21 = arith.mulf %20, %19 : vector<16x256xf32>
    %c0_14 = arith.constant 0 : index
    %c0_15 = arith.constant 0 : index
    %22 = vector.load %arg6[%c0_14, %c0_15] : memref<16x256xf32, #tpu.memory_space<vmem>>, vector<16x256xf32>
    tpu.vector_store %arg6[%c0_14, %c0_15], %21 {strides = array<i32>} : memref<16x256xf32, #tpu.memory_space<vmem>>, vector<16x256xf32>,
    return
  }
  func.func @transform_0(%arg0: i32) -> (i32, i32) {
    %c0_i32 = arith.constant 0 : i32
    %c0_i32_0 = arith.constant 0 : i32
    return %arg0, %c0_i32 : i32, i32
  }
  func.func @transform_1(%arg0: i32) -> (i32, i32) {
    %c0_i32 = arith.constant 0 : i32
    %c0_i32_0 = arith.constant 0 : i32
    %c0_i32_1 = arith.constant 0 : i32
    return %c0_i32, %c0_i32_0 : i32, i32
  }
  func.func @transform_2(%arg0: i32) -> (i32, i32) {
    %c0_i32 = arith.constant 0 : i32
    %c0_i32_0 = arith.constant 0 : i32
    %c0_i32_1 = arith.constant 0 : i32
    return %c0_i32, %c0_i32_0 : i32, i32
  }
  func.func @transform_3(%arg0: i32) -> (i32, i32) {
    %c0_i32 = arith.constant 0 : i32
    %c0_i32_0 = arith.constant 0 : i32
    %c0_i32_1 = arith.constant 0 : i32
    return %c0_i32, %c0_i32_0 : i32, i32
  }
  func.func @transform_4(%arg0: i32) -> (i32, i32) {
    %c0_i32 = arith.constant 0 : i32
    %c0_i32_0 = arith.constant 0 : i32
    %c0_i32_1 = arith.constant 0 : i32
    return %c0_i32, %c0_i32_0 : i32, i32
  }
  func.func @transform_5(%arg0: i32) -> (i32, i32) {
    %c0_i32 = arith.constant 0 : i32
    %c0_i32_0 = arith.constant 0 : i32
    return %arg0, %c0_i32 : i32, i32
  }
}

</mosaic_0001>

<bundles_post_ra>
// kernel: tpu_custom_call.1
= control target key start
LH: loop header
LB: loop body
LE: loop exit
PB: predicated region body
PF: predicated region fallthrough
CT: control target
= control target key end

     0   :  { %s1277_s0 = inlined_call_operand.hbm [shape: f32[20,64], index: 0, kind: input, shape index: {}]   ;;  %s1278_s1 = inlined_call_operand.hbm [shape: bf16[64,128], index: 1, kind: input, shape index: {}]   ;;  %s1279_s2 = inlined_call_operand.vmem [shape: f32[1,128], index: 2, kind: input, shape index: {}]   ;;  %s1280_s3 = inlined_call_operand.hbm [shape: bf16[128,256], index: 3, kind: input, shape index: {}]   ;;  %s1281_s4 = inlined_call_operand.vmem [shape: f32[1,256], index: 4, kind: input, shape index: {}]   ;;  %s1282_s5 = inlined_call_operand.hbm [shape: f32[20,256], index: 5, kind: output, shape index: {}]  }
   0x1   :  { %1286 = sst [smem:[#allocation12_spill]] %s1278_s1 }
   0x2   :  { %10 = vsyncpa [#allocation3], 0 }
   0x3   :  { %12 = vsyncpa [#allocation3 + $0x1], 0 }
   0x4   :  { %13 = vsyncpa [#allocation6], 0 }
   0x5   :  { %14 = vsyncpa [#allocation4], 0 }
   0x6   :  { %16 = vsyncpa [#allocation4 + $0x1], 0  ;;  %s1058_s18 = smov 0   ;;  %s1060_s19 = smov 0  }
   0x7   :  { %s1062_s20 = smov 0   ;;  %s1064_s21 = smov 0  }
   0x8 LB: > { %s1079_s22 = sadd.s32 4294967295, %s1014_s21   ;;  %s624_s23 = sadd.s32 4294967294, %s1014_s21   ;;  %s1014_s21 = sphi %s1064_s21, %s1303_s21   ;;  %s1010_s20 = sphi %s1062_s20, %s1302_s20   ;;  %s1006_s19 = sphi %s1060_s19, %s1301_s19   ;;  %s1002_s18 = sphi %s1058_s18, %s1300_s18  }
   0x9   : > { %s1083_s24 = sadd.s32 1, %s1014_s21   ;;  %s29_s25 = sadd.s32 1, %s1010_s20 }
   0xa   : > { %s26_s26 = ssub.s32 %s1014_s21, %s1083_s24  ;;  %p36_p0 = scmp.ne.s32.totalorder %s1010_s20, %s1006_s19 }
   0xb   : > { %p27_p1 = scmp.eq.s32.totalorder %s26_s26, 0  ;;  %p37_p2 = scmp.eq.s32.totalorder %s1014_s21, 0 }
   0xc   : > { %p42_p3 = scmp.ne.s32.totalorder %s1006_s19, %s1002_s18  ;;  %p1285_p4 = scmp.eq.s32.totalorder %s1079_s22, 0 }
   0xd   : > { %s1095_s27 = scalar_select %p27_p1, %s1010_s20, %s29_s25  }
   0xe   : > { %p1097_p5 = por %p37_p2, %p36_p0  ;;  %p1103_p6 = por %p1285_p4, %p42_p3 }
   0xf   : > { %p150_p7 = scmp.eq.s32.totalorder %s1079_s22, 1  ;;  %p156_p8 = scmp.eq.s32.totalorder %s624_s23, 1 }
  0x10   : > { %p625_p9 = scmp.ge.s32.totalorder %s1014_s21, 1  ;;  %p163_p10 = scmp.lt.s32.totalorder %s1014_s21, 3 }
  0x11   : > { %p1110_p11 = por %p150_p7, %p36_p0  ;;  %p1114_p12 = por %p156_p8, %p42_p3 }
  0x12   : > { %p1118_p13 = pnand %p625_p9, %p163_p10  ;;  %s1292_s1 = sld [smem:[#allocation12_spill]] }
  0x13   : > { %s1290_s6 = scalar_select %p1114_p12, 1, 0 }
  0x14   : > { %p767_p1 = pneg %p1118_p13  ;;  %s1016_s11 = smov [#allocation5]  }
  0x15   : > { %s176_s12 = sshll.u32 %s1016_s11, 4  ;;  %s191_s15 = sshll.u32 %s1280_s3, 4  ;;  %s177_s12 = int_to_ptr.vmem [resolvable:$true] %s176_s12  ;;  %s192_s15 = int_to_ptr.hbm [resolvable:$true] %s191_s15 }
  0x16   : > { %p768_p0 = pnand %p767_p1, %p1285_p4  ;;  %s1017_s16 = smov 64  }
  0x17   : > { %s1018_s17 = smov 4   ;;  %s1019_s23 = smov [#allocation7]  }
  0x18   : > { %s174_s10 = sshll.u32 %s1292_s1, 4  ;;  %s193_s25 = sshll.u32 %s1019_s23, 4  ;;  %s175_s10 = int_to_ptr.hbm [resolvable:$true] %s174_s10  ;;  %s194_s25 = int_to_ptr.vmem [resolvable:$true] %s193_s25 }
  0x19   : > { %770 = dma.hbm_to_vmem [thread:$0]  (!%p768_p0), %s175_s10, 512, %s177_s12, [#allocation6], %s1017_s16, %s1017_s16, %s1018_s17  }
  0x1a   : > { %s1020_s26 = smov 128   ;;  %s1021_s8 = smov 8  }
  0x1b   : > { %773 = dma.hbm_to_vmem [thread:$0]  (!%p768_p0), %s192_s15, 2048, %s194_s25, [#allocation6], %s1020_s26, %s1020_s26, %s1021_s8  }
  0x1c   : > { %p1284_p2 = scmp.ge.s32.totalorder %s1014_s21, 2 }
  0x1e   : > { %206 = sbr.rel (%p1284_p2) target bundleno = 72 (0x48), region = 32 }
  0x23   : > { %209 = sbr.rel (!%p1097_p5) target bundleno = 72 (0x48), region = 36  ;;  %s210_s9 = sand.u32 (%p1097_p5), 1, %s1010_s20  }
  0x24   : > { %s630_s11 = sshll.u32 (%p1097_p5), %s1014_s21, 1  ;;  %s629_s13 = sshll.u32 (%p1097_p5), %s210_s9, 4 }
  0x25   : > { %s216_s10 = ssub.s32 (%p1097_p5), 3, %s630_s11  ;;  %s1142_s16 = scalar_lea.sflag (%p1097_p5), [#allocation3], %s210_s9 }
  0x26   : > { %p217_p3 = scmp.lt.s32.totalorder (%p1097_p5), %s216_s10, 2  ;;  %s214_s17 = scalar_lea.vmem (%p1097_p5), [#allocation2], %s629_s13 }
  0x28   : > { %s1305_s10 = smov (!%p217_p3, %s216_s10), 2 }
  0x29   : > { %s631_s12 = sshll.u32 %s1305_s10, 3 }
  0x2a   : > { %s220_s14 = ssub.s32 16, %s631_s12 }
  0x2b   : > { %s221_s15 = sshll.u32 %s220_s14, 4 }
  0x2c   : > { %222 = vsyncadd %s1142_s16, %s221_s15  ;;  %p1145_p5 = scmp.ne.s32.totalorder %s631_s12, 0  ;;  %s733_s23 = sshll.u32 %s1014_s21, 4 }
  0x2d   : > { %s225_s8 = scalar_lea.hbm %s1277_s0, %s733_s23  ;;  %s1153_s11 = sshll.u32 %s214_s17, 4  ;;  %s230_s11 = int_to_ptr.vmem [resolvable:$true] %s1153_s11 }
  0x2e   : > { %s227_s9 = sshll.u32 %s225_s8, 4  ;;  %s1283_s13 = sshll.u32 %s1305_s10, 7  ;;  %s1156_s9 = int_to_ptr.hbm [resolvable:$true] %s227_s9 }
  0x2f   : > { %s894_s14 = sshra.s32 %s1156_s9, 4  ;;  %s896_s12 = sshrl.u32 %s1283_s13, 4  ;;  %s895_s14 = int_to_ptr.hbm [resolvable:$true] %s894_s14 }
  0x30   : > { %s901_s15 = scalar_lea.hbm %s895_s14, %s896_s12  ;;  %s905_s17 = scalar_lea.hbm %s1277_s0, 24 }
  0x31   : > { %p902_p7 = scmp.ne.s32.totalorder %s895_s14, %s901_s15  ;;  %p906_p10 = scmp.lt.s32.totalorder %s895_s14, %s1277_s0 }
  0x32   : > { %p907_p1 = scmp.lt.s32.totalorder %s905_s17, %s901_s15 }
  0x33   : > { %p903_p8 = pnand %p902_p7, %p1145_p5 }
  0x34   : > { %p908_p0 = por %p907_p1, %p906_p10 }
  0x35   : > { %p904_p9 = pneg %p903_p8 }
  0x37   : > { %p909_p3 = pnand %p908_p0, %p904_p9 }
  0x39   : > { %912 = shalt.err (!%p909_p3)
}
  0x3a   : > { %s913_s13 = sshra.s32 %s230_s11, 4  ;;  %s1022_s25 = smov [#allocation2]   ;;  %s914_s13 = int_to_ptr.vmem [resolvable:$true] %s913_s13 }
  0x3b   : > { %s920_s1 = scalar_lea.vmem %s914_s13, %s896_s12  ;;  %s924_s23 = scalar_lea.vmem %s1022_s25, 32 }
  0x3c   : > { %p921_p7 = scmp.ne.s32.totalorder %s914_s13, %s920_s1  ;;  %p926_p4 = scmp.lt.s32.totalorder %s924_s23, %s920_s1 }
  0x3e   : > { %p922_p8 = pnand %p921_p7, %p1145_p5 }
  0x40   : > { %p923_p2 = pneg %p922_p8 }
  0x42   : > { %p928_p12 = pnand %p926_p4, %p923_p2 }
  0x44   : > { %931 = shalt.err (!%p928_p12)
}
  0x45   : > { %s1023_s14 = smov 128   ;;  %s1024_s15 = smov 8  }
  0x46   : > { %s1294_s17 = sshll.u32 %s1305_s10, 7 }
  0x47   : > { %235 = dma.hbm_to_vmem [thread:$0]  (%p1145_p5), %s1156_s9, %s1294_s17, %s230_s11, %s1142_s16, %s1023_s14, %s1023_s14, %s1024_s15  }
  0x48 PF: > { %241 = sbr.rel (%p1118_p13) target bundleno = 424 (0x1a8), region = 40  ;;  %s1185_s1 = sand.u32 (!%p1118_p13), 1, %s1006_s19  }
  0x49   : > { %s637_s13 = sshll.u32 (!%p1118_p13), %s1185_s1, 4  ;;  %s244_s12 = scalar_lea.sflag (!%p1118_p13), [#allocation3], %s1185_s1 }
  0x4a   : > { %s1189_s26 = scalar_lea.vmem (!%p1118_p13), [#allocation2], %s637_s13 }
  0x4d   : > { %989 = dma.done.wait (%p1103_p6), %s244_s12, 256  }
  0x4e   : > { %991 = vsyncadd (%p1103_p6), %s244_s12, 4294967040  ;;  %p1295_p4 = scmp.eq.s32.totalorder %s1079_s22, 0 }
  0x50   : > { %993 = dma.done.wait (%p1295_p4), [#allocation6], 2560   ;;  %p1296_p12 = pmov %p1295_p4 }
  0x51   : > { %v737_v0 = vld [vmem:[#allocation5 + $0x18] sm:$0xff]  ;;  %v736_v1 = vld [vmem:[#allocation5 + $0x10] sm:$0xff]  ;;  %v708_v7 = vld [vmem:[#allocation7 + $0x60] sm:$0xf]  ;;  %vm336_vm0 = vcmask 523264   ;;  %s640_s28 = sshll.u32 %s1185_s1, 5 }
  0x52   : > { %995 = vsyncadd (%p1296_p12), [#allocation6], 4294964736  ;;  %344 = vmatpush.bf16.msra.mxu0 %v737_v0  ;;  %v716_v2 = vld [vmem:[#allocation7 + $0x70] sm:$0xf]  ;;  %v753_v3 = vld [vmem:[#allocation7 + $0x74] sm:$0xf0] }
  0x53   : > { %v752_v4 = vld [vmem:[#allocation7 + $0x74] sm:$0xf]  ;;  %v717_v5 = vor.u32 %v753_v3, %v716_v2  ;;  %v718_v6 = vld [vmem:[#allocation7 + $0x78] sm:$0xf0]  ;;  %v751_v8 = vld [vmem:[#allocation7 + $0x64] sm:$0xf0] }
  0x54   : > { %v721_v9 = vor.u32 %v752_v4, %v718_v6  ;;  %v750_v10 = vld [vmem:[#allocation7 + $0x64] sm:$0xf]  ;;  %v710_v11 = vld [vmem:[#allocation7 + $0x68] sm:$0xf0]  ;;  %v709_v12 = vor.u32 %v751_v8, %v708_v7  ;;  %v700_v15 = vld [vmem:[#allocation7 + $0x50] sm:$0xf] }
  0x55   : > { %459 = vmatpush.bf16.msra.mxu1 %v717_v5  ;;  %v735_v13 = vld [vmem:[#allocation5 + $0x8] sm:$0xff]  ;;  %v713_v14 = vor.u32 %v750_v10, %v710_v11  ;;  %v749_v16 = vld [vmem:[#allocation7 + $0x54] sm:$0xf0]  ;;  %v748_v17 = vld [vmem:[#allocation7 + $0x54] sm:$0xf]  ;;  %s1208_s11 = scalar_lea.vmem [#allocation8], %s640_s28 }
  0x56   : > { %345 = vmatpush.bf16.msra.mxu0 %v736_v1  ;;  %473 = vmatpush.bf16.msra.mxu2 %v721_v9  ;;  %v702_v18 = vld [vmem:[#allocation7 + $0x58] sm:$0xf0]  ;;  %v734_v19 = vld [vmem:[#allocation5] sm:$0xff]  ;;  %v701_v21 = vor.u32 %v749_v16, %v700_v15  ;;  %v747_v25 = vld [vmem:[#allocation7 + $0x44] sm:$0xf0]  ;;  %s508_s9 = scalar_lea.sflag [#allocation4], %s1185_s1 }
  0x57   : > { %v297_v20 = vld [vmem:[%s1189_s26] sm:$0xff]  ;;  %v298_v22 = vld [vmem:[%s1189_s26 + $0x8] sm:$0xff]  ;;  %v705_v23 = vor.u32 %v748_v17, %v702_v18  ;;  %s723_s8 = sshll.u32 (%p1110_p11), %s1079_s22, 1 }
  0x58   : > { %v692_v24 = vld [vmem:[#allocation7 + $0x40] sm:$0xf]  ;;  %v746_v26 = vld [vmem:[#allocation7 + $0x44] sm:$0xf]  ;;  %v694_v27 = vld [vmem:[#allocation7 + $0x48] sm:$0xf0]  ;;  %v299_v28 = vpack.c.bf16 %v298_v22, %v297_v20 }
  0x59   : > { %460 = vmatpush.bf16.msra.mxu1 %v709_v12  ;;  %v693_v29 = vor.u32 %v747_v25, %v692_v24  ;;  %v697_v30 = vor.u32 %v746_v26, %v694_v27  ;;  %v684_v31 = vld [vmem:[#allocation7 + $0x30] sm:$0xf]  ;;  %v745_v32 = vld [vmem:[#allocation7 + $0x34] sm:$0xf0]  ;;  %v744_v33 = vld [vmem:[#allocation7 + $0x34] sm:$0xf] }
  0x5a   : > { %346 = vmatpush.bf16.msra.mxu0 %v735_v13  ;;  %474 = vmatpush.bf16.msra.mxu2 %v713_v14  ;;  %v685_v34 = vor.u32 %v745_v32, %v684_v31  ;;  %v686_v35 = vld [vmem:[#allocation7 + $0x38] sm:$0xf0]  ;;  %v676_v37 = vld [vmem:[#allocation7 + $0x20] sm:$0xf]  ;;  %v743_v38 = vld [vmem:[#allocation7 + $0x24] sm:$0xf0] }
  0x5b   : > { %v689_v36 = vor.u32 %v744_v33, %v686_v35  ;;  %v742_v39 = vld [vmem:[#allocation7 + $0x24] sm:$0xf]  ;;  %v677_v40 = vor.u32 %v743_v38, %v676_v37  ;;  %v678_v41 = vld [vmem:[#allocation7 + $0x28] sm:$0xf0]  ;;  %v668_v43 = vld [vmem:[#allocation7 + $0x10] sm:$0xf] }
  0x5c   : > { %v681_v42 = vor.u32 %v742_v39, %v678_v41  ;;  %v741_v44 = vld [vmem:[#allocation7 + $0x14] sm:$0xf0]  ;;  %v740_v45 = vld [vmem:[#allocation7 + $0x14] sm:$0xf]  ;;  %v670_v47 = vld [vmem:[#allocation7 + $0x18] sm:$0xf0] }
  0x5d   : > { %461 = vmatpush.bf16.msra.mxu1 %v701_v21  ;;  %v669_v46 = vor.u32 %v741_v44, %v668_v43  ;;  %v673_v48 = vor.u32 %v740_v45, %v670_v47  ;;  %v660_v49 = vld [vmem:[#allocation7] sm:$0xf]  ;;  %v739_v50 = vld [vmem:[#allocation7 + $0x4] sm:$0xf0]  ;;  %v738_v51 = vld [vmem:[#allocation7 + $0x4] sm:$0xf] }
  0x5e   : > { %347 = vmatpush.bf16.msra.mxu0 %v734_v19  ;;  %475 = vmatpush.bf16.msra.mxu2 %v705_v23  ;;  %v661_v52 = vor.u32 %v739_v50, %v660_v49  ;;  %v662_v53 = vld [vmem:[#allocation7 + $0x8] sm:$0xf0]  ;;  %v825_v56 = vld [vmem:[%s1279_s2] ss:$0 sm:$0xff]  ;;  %s516_s25 = ssub.s32 (%p1110_p11), 3, %s723_s8 }
  0x5f   : > { %v665_v54 = vor.u32 %v738_v51, %v662_v53  ;;  %v373_v63 = vld [vmem:[%s1281_s4] sm:$0x3]  ;;  %p517_p6 = scmp.lt.s32.totalorder (%p1110_p11), %s516_s25, 2 }
  0x60   : > { %v375_v0 = vperm.slane %v373_v63, 0  ;;  %v376_v4 = vperm.slane %v373_v63, 1 }
  0x61   : > { %657 = vmatmul.msk.bf16.vlgmr.msra.gmra.mxu0 %vm336_vm0, %v299_v28  ;;  %462 = vmatpush.bf16.msra.mxu1 %v693_v29 }
  0x62   : > { %476 = vmatpush.bf16.msra.mxu2 %v697_v30 }
  0x65   : > { %463 = vmatpush.bf16.msra.mxu1 %v685_v34 }
  0x66   : > { %477 = vmatpush.bf16.msra.mxu2 %v689_v36 }
  0x69   : > { %464 = vmatpush.bf16.msra.mxu1 %v677_v40 }
  0x6a   : > { %478 = vmatpush.bf16.msra.mxu2 %v681_v42 }
  0x6d   : > { %465 = vmatpush.bf16.msra.mxu1 %v669_v46 }
  0x6e   : > { %479 = vmatpush.bf16.msra.mxu2 %v673_v48 }
  0x71   : > { %466 = vmatpush.bf16.msra.mxu1 %v661_v52 }
  0x72   : > { %480 = vmatpush.bf16.msra.mxu2 %v665_v54 }
  0xde   : > { %v349_v55 = vpop.f32.mrf.mxu0 }
  0xdf   : > { %v350_v57 = vadd.f32 %v825_v56, %v349_v55 }
  0xe1   : > { %v354_v60 = vmax.f32 %v350_v57, 0.0 }
  0xe6   : > { %v351_v58 = vpop.f32.mrf.mxu0 }
  0xe7   : > { %v352_v59 = vadd.f32 %v825_v56, %v351_v58 }
  0xe9   : > { %v355_v61 = vmax.f32 %v352_v59, 0.0 }
  0xeb   : > { %v356_v62 = vpack.c.bf16 %v355_v61, %v354_v60 }
  0xed   : > { %467 = vmatmul.bf16.vlgmr.msra.gmra.mxu1 %v356_v62  ;;  %481 = vmatmul.bf16.vlgmr.msra.gmra.mxu2 %v356_v62 }
 0x16a   : > { %v468_v1 = vpop.f32.mrf.mxu1 }
 0x16b   : > { %v469_v2 = vadd.f32 %v468_v1, %v375_v0 }
 0x16d   : > { %v487_v3 = vmul.f32 0.5, %v469_v2 }
 0x16f   : > { %826 = vtanh.f32 %v487_v3 }
 0x170   : > { %v482_v5 = vpop.f32.mrf.mxu2 }
 0x171   : > { %v483_v6 = vadd.f32 %v482_v5, %v376_v4 }
 0x172   : > { %v470_v7 = vpop.f32.mrf.mxu1 }
 0x173   : > { %v488_v8 = vmul.f32 0.5, %v483_v6  ;;  %v471_v9 = vadd.f32 %v470_v7, %v375_v0 }
 0x175   : > { %v827_v10 = vpop.eup %826  ;;  %828 = vtanh.f32 %v488_v8  ;;  %v489_v11 = vmul.f32 0.5, %v471_v9 }
 0x176   : > { %v495_v12 = vadd.f32 1.0, %v827_v10 }
 0x177   : > { %830 = vtanh.f32 %v489_v11 }
 0x178   : > { %v499_v13 = vmul.f32 0.5, %v495_v12  ;;  %v484_v14 = vpop.f32.mrf.mxu2 }
 0x179   : > { %v485_v15 = vadd.f32 %v484_v14, %v376_v4 }
 0x17a   : > { %503 = vst [vmem:[%s1208_s11] sm:$0xff] %v499_v13 }
 0x17b   : > { %v829_v16 = vpop.eup %828  ;;  %v490_v17 = vmul.f32 0.5, %v485_v15 }
 0x17c   : > { %v496_v18 = vadd.f32 1.0, %v829_v16 }
 0x17d   : > { %v831_v19 = vpop.eup %830  ;;  %832 = vtanh.f32 %v490_v17 }
 0x17e   : > { %v500_v20 = vmul.f32 0.5, %v496_v18  ;;  %v497_v21 = vadd.f32 1.0, %v831_v19 }
 0x180   : > { %504 = vst [vmem:[%s1208_s11 + $0x8] sm:$0xff] %v500_v20  ;;  %v501_v22 = vmul.f32 0.5, %v497_v21 }
 0x182   : > { %505 = vst [vmem:[%s1208_s11 + $0x10] sm:$0xff] %v501_v22 }
 0x183   : > { %v833_v23 = vpop.eup %832 }
 0x184   : > { %v498_v24 = vadd.f32 1.0, %v833_v23  ;;  %514 = sbr.rel (!%p1110_p11) target bundleno = 424 (0x1a8), region = 56 }
 0x186   : > { %v502_v25 = vmul.f32 0.5, %v498_v24 }
 0x188   : > { %506 = vst [vmem:[%s1208_s11 + $0x18] sm:$0xff] %v502_v25 }
 0x189   : > { %s1307_s25 = smov (!%p517_p6, %s516_s25), 2 }
 0x18a   : > { %s754_s23 = sshll.u32 %s1307_s25, 4 }
 0x18b   : > { %s521_s14 = ssub.s32 32, %s754_s23 }
 0x18c   : > { %s522_s15 = sshll.u32 %s521_s14, 4 }
 0x18d   : > { %523 = vsyncadd %s508_s9, %s522_s15  ;;  %p1223_p13 = scmp.ne.s32.totalorder %s754_s23, 0  ;;  %s756_s17 = sshll.u32 %s1079_s22, 5 }
 0x18e   : > { %s527_s26 = scalar_lea.hbm %s1282_s5, %s756_s17  ;;  %s529_s29 = sshll.u32 %s1208_s11, 4  ;;  %s1232_s29 = int_to_ptr.vmem [resolvable:$true] %s529_s29 }
 0x18f   : > { %s531_s7 = sshll.u32 %s527_s26, 4  ;;  %s730_s10 = sshll.u32 %s1307_s25, 8  ;;  %s1234_s7 = int_to_ptr.hbm [resolvable:$true] %s531_s7 }
 0x190   : > { %s933_s16 = sshra.s32 %s1232_s29, 4  ;;  %s935_s28 = sshrl.u32 %s730_s10, 4  ;;  %s934_s16 = int_to_ptr.vmem [resolvable:$true] %s933_s16 }
 0x191   : > { %s940_s8 = scalar_lea.vmem %s934_s16, %s935_s28  ;;  %s1025_s22 = smov [#allocation8]  }
 0x192   : > { %p941_p11 = scmp.ne.s32.totalorder %s934_s16, %s940_s8  ;;  %s944_s23 = scalar_lea.vmem %s1025_s22, 64 }
 0x193   : > { %p946_p9 = scmp.lt.s32.totalorder %s944_s23, %s940_s8 }
 0x194   : > { %p942_p2 = pnand %p941_p11, %p1223_p13 }
 0x196   : > { %p943_p5 = pneg %p942_p2 }
 0x198   : > { %p948_p10 = pnand %p946_p9, %p943_p5 }
 0x19a   : > { %951 = shalt.err (!%p948_p10)
}
 0x19b   : > { %s952_s11 = sshra.s32 %s1234_s7, 4  ;;  %s963_s13 = scalar_lea.hbm %s1282_s5, 48  ;;  %s953_s11 = int_to_ptr.hbm [resolvable:$true] %s952_s11 }
 0x19c   : > { %s959_s14 = scalar_lea.hbm %s953_s11, %s935_s28  ;;  %p964_p7 = scmp.lt.s32.totalorder %s953_s11, %s1282_s5 }
 0x19d   : > { %p960_p1 = scmp.ne.s32.totalorder %s953_s11, %s959_s14  ;;  %p965_p8 = scmp.lt.s32.totalorder %s963_s13, %s959_s14 }
 0x19f   : > { %p961_p0 = pnand %p960_p1, %p1223_p13  ;;  %p966_p4 = por %p965_p8, %p964_p7 }
 0x1a1   : > { %p962_p3 = pneg %p961_p0 }
 0x1a3   : > { %p967_p12 = pnand %p966_p4, %p962_p3 }
 0x1a5   : > { %970 = shalt.err (!%p967_p12)
}
 0x1a6   : > { %s1026_s16 = smov 256   ;;  %s1027_s28 = smov 16  }
 0x1a7   : > { %537 = dma.vmem_to_hbm [thread:$0]  (%p1223_p13), %s1232_s29, %s730_s10, %s1234_s7, %s508_s9, %s1026_s16, %s1026_s16, %s1027_s28  }
 0x1a8 PF: > { %s546_s8 = sand.u32 1, %s1002_s18   ;;  %p1298_p6 = scmp.ne.s32.totalorder %s1290_s6, 0 }
 0x1a9   : > { %p1299_p11 = scmp.ge.s32.totalorder %s1014_s21, 2  ;;  %s547_s22 = scalar_lea.sflag [#allocation4], %s546_s8 }
 0x1ab   : > { %p775_p2 = pnand %p1299_p11, %p1298_p6 }
 0x1ad   : > { %p776_p5 = pneg %p775_p2 }
 0x1af   : > { %997 = dma.done.wait (%p776_p5), %s547_s22, 512  }
 0x1b0   : > { %999 = vsyncadd (%p776_p5), %s547_s22, 4294966784  ;;  %p19_p9 = scmp.ge.s32.totalorder %s1083_s24, 4   ;;  %s1300_s18 = smov %s1006_s19 }
 0x1b1   : > { %s1301_s19 = smov %s1010_s20  ;;  %s1302_s20 = smov %s1095_s27 }
 0x1b2   : > { %s1303_s21 = smov %s1083_s24  ;;  %21 = sbr.rel (!%p19_p9) target bundleno = 8 (0x8), region = 93 }
 0x1b7   :  { %553 = vsyncpa [#allocation3], 1 }
 0x1b8   :  { %555 = vsyncpa [#allocation3 + $0x1], 1 }
 0x1b9   :  { %556 = vsyncpa [#allocation6], 1 }
 0x1ba   :  { %557 = vsyncpa [#allocation4], 1 }
 0x1bb   :  { %559 = vsyncpa [#allocation4 + $0x1], 1 }

</bundles_post_ra>
